<compile_context>
chip_gen: v7x
topology: tpu7x:2x2x1
jax: 0.10.0
libtpu: 0.0.40
codegen_flags: <defaults>
</compile_context>

<pallas_src>
import jax
import jax.numpy as jnp
from jax.experimental import pallas as pl
from jax.experimental.pallas import tpu as pltpu

N_CLASSES = 12
SMOOTH = 1e-6  # cancels exactly in (union + S) - (inter + S); kept for documentation
# UnionMinusIntesectionLoss.__init__ default: target_shape=(12, 512, 512)
UI_LOSS_WEIGHT = 1.0 / (512 * 512 / N_CLASSES)

# Per-class weights from WeightedCrossEntropy.__init__ (deterministic constants).
CE_WEIGHT_LIST = (
    0.000305107996, 0.362784246, 0.00967408198, 0.00234700842,
    0.0293149291, 0.0236560588, 0.0269401083, 0.00757726622,
    0.0142296838, 0.00180541606, 0.480674631, 0.0406914633,
)
CE_WEIGHTS = jnp.array(CE_WEIGHT_LIST, dtype=jnp.float32)  # wrapper/reference only


def _loss_kernel(x_ref, tgt_ref, num_ref, den_ref, ui_ref,
                 num_acc, den_acc, ui_acc):
    pt = pl.program_id(1)

    @pl.when(pt == 0)
    def _init():
        num_acc[...] = jnp.zeros_like(num_acc)
        den_acc[...] = jnp.zeros_like(den_acc)
        ui_acc[...] = jnp.zeros_like(ui_acc)

    x = x_ref[...].astype(jnp.float32)   # (C, TP) logits (bf16 cast in-register)
    tgt = tgt_ref[...]                   # (1, TP) int32 labels

    # log-sum-exp over the class (sublane) axis
    m = jnp.max(x, axis=0, keepdims=True)           # (1, TP)
    e = jnp.exp(x - m)                               # (C, TP)
    s = jnp.sum(e, axis=0, keepdims=True)            # (1, TP)
    lse = m + jnp.log(s)                             # (1, TP)

    # one-hot target via iota-compare, only used to pick the target logit
    cls = jax.lax.broadcasted_iota(jnp.int32, x.shape, 0)
    t = (cls == tgt).astype(jnp.float32)             # (C, TP)
    picked = jnp.sum(t * x, axis=0, keepdims=True)   # (1, TP) logit at target

    # per-pixel class weight via scalar-constant select chain (no weight DMA)
    wy = jnp.zeros_like(picked)
    for c, wc in enumerate(CE_WEIGHT_LIST):
        wy = jnp.where(tgt == c, jnp.float32(wc), wy)

    # weighted CE pieces (PyTorch 'mean' reduction with class weights)
    num_acc[...] += wy * (lse - picked)
    den_acc[...] += wy

    # union - inter per pixel == sum_c (p + t - 2*p*t) == 2*(1 - p_y)
    p_y = jnp.exp(picked - lse)
    ui_acc[...] += 2.0 * (1.0 - p_y)

    @pl.when(pt == pl.num_programs(1) - 1)
    def _finalize():
        num_ref[...] = jnp.sum(num_acc[...], keepdims=True)
        den_ref[...] = jnp.sum(den_acc[...], keepdims=True)
        ui_ref[...] = jnp.sum(ui_acc[...], keepdims=True)


def _pick_tile(P, cap=16384):
    """Largest pixel tile <= cap that tiles P (multiple of 128 unless tp == P)."""
    if P <= cap:
        return P
    best = 0
    t = 128
    while t <= cap:
        if P % t == 0:
            best = t
        t += 128
    if best == 0:
        raise ValueError(f"cannot tile spatial size {P} by a multiple of 128")
    return best


def combined_loss(logits, target, *, tp=None):
    """logits: (N, C, H, W) float (f32 or bf16); target: (N, H, W) int labels."""
    N, C, H, W = logits.shape
    assert C == N_CLASSES, "class-weight vector fixes C=12"
    P = H * W
    if tp is None:
        tp = _pick_tile(P)
    assert P % tp == 0 and (tp == P or tp % 128 == 0)

    x = logits.reshape(N, C, P)                 # keep input dtype (bf16 stays bf16)
    tgt = target.reshape(N, 1, P).astype(jnp.int32)

    out_struct = jax.ShapeDtypeStruct((N, 1, 1), jnp.float32)
    out_block = pl.BlockSpec((None, 1, 1), lambda n, p: (n, 0, 0))

    ce_num, ce_den, ui_sum = pl.pallas_call(
        _loss_kernel,
        out_shape=(out_struct, out_struct, out_struct),
        grid_spec=pltpu.PrefetchScalarGridSpec(
            num_scalar_prefetch=0,
            grid=(N, P // tp),
            in_specs=[
                pl.BlockSpec((None, C, tp), lambda n, p: (n, 0, p)),  # logits tile
                pl.BlockSpec((None, 1, tp), lambda n, p: (n, 0, p)),  # target tile
            ],
            out_specs=[out_block, out_block, out_block],
            scratch_shapes=[pltpu.VMEM((1, tp), jnp.float32)] * 3,
        ),
        compiler_params=pltpu.CompilerParams(
            dimension_semantics=("parallel", "arbitrary")),
    )(x, tgt)

    ce = jnp.sum(ce_num) / jnp.sum(ce_den)
    ui = jnp.sum(ui_sum) / float(N * C) * UI_LOSS_WEIGHT
    return ce + ui


def _reference(logits, target):
    """Pure-JAX reference mirroring the PyTorch forward."""
    x = logits.astype(jnp.float32)
    N, C, H, W = x.shape
    logp = jax.nn.log_softmax(x, axis=1)
    t1h = jax.nn.one_hot(target, C, axis=1, dtype=jnp.float32)
    wy = CE_WEIGHTS[target]                       # (N, H, W)
    picked = jnp.sum(t1h * logp, axis=1)          # log p at target class
    ce = jnp.sum(-wy * picked) / jnp.sum(wy)

    p = jax.nn.softmax(x, axis=1)
    inter = jnp.sum((p * t1h).reshape(N, C, -1), axis=2) + SMOOTH
    union = jnp.sum((p + t1h - p * t1h).reshape(N, C, -1), axis=2) + SMOOTH
    ui = jnp.mean(union - inter) * UI_LOSS_WEIGHT
    return ce + ui


if __name__ == "__main__":
    key = jax.random.PRNGKey(0)
    k1, k2 = jax.random.split(key)
    N, C, H, W = 2, 12, 16, 16
    logits = jax.random.normal(k1, (N, C, H, W), dtype=jnp.float32)
    target = jax.random.randint(k2, (N, H, W), 0, C, dtype=jnp.int32)

    loss = combined_loss(logits, target)
    jax.block_until_ready(loss)

    ref = _reference(logits, target)
    assert bool(jnp.allclose(loss, ref, rtol=1e-4, atol=1e-5)), (loss, ref)
    print("KERNEL_OK")
</pallas_src>

<mosaic_0001>
module attributes {stable_mosaic.version = 11 : i64} {
  func.func @_loss_kernel(%arg0: i32, %arg1: i32, %arg2: memref<1x12x256xf32, #tpu.memory_space<vmem>>, %arg3: memref<1x1x256xi32, #tpu.memory_space<vmem>>, %arg4: memref<1x1x1xf32, #tpu.memory_space<vmem>>, %arg5: memref<1x1x1xf32, #tpu.memory_space<vmem>>, %arg6: memref<1x1x1xf32, #tpu.memory_space<vmem>>, %arg7: memref<1x256xf32, #tpu.memory_space<vmem>>, %arg8: memref<1x256xf32, #tpu.memory_space<vmem>>, %arg9: memref<1x256xf32, #tpu.memory_space<vmem>>) attributes {dimension_semantics = [#tpu.dimension_semantics<parallel>, #tpu.dimension_semantics<arbitrary>], iteration_bounds = array<i64: 2, 1>, scalar_prefetch = 0 : i64, scratch_operands = 3 : i64, tpu.core_type = #tpu.core_type<tc>, window_params = [{transform_indices = @transform_0, window_bounds = array<i64: 1, 12, 256>}, {transform_indices = @transform_1, window_bounds = array<i64: 1, 1, 256>}, {transform_indices = @transform_2, window_bounds = array<i64: 1, 1, 1>}, {transform_indices = @transform_3, window_bounds = array<i64: 1, 1, 1>}, {transform_indices = @transform_4, window_bounds = array<i64: 1, 1, 1>}]} {
    %c0_i32 = arith.constant 0 : i32
    %0 = arith.cmpi eq, %arg1, %c0_i32 : i32
    %1 = arith.extui %0 : i1 to i32
    %c0_i32_0 = arith.constant 0 : i32
    %2 = arith.cmpi ne, %1, %c0_i32_0 : i32
    scf.if %2 {
      %cst_38 = arith.constant 0.000000e+00 : f32
      %93 = vector.broadcast %cst_38 : f32 to vector<1x256xf32>
      %c0_39 = arith.constant 0 : index
      %c0_40 = arith.constant 0 : index
      %94 = vector.load %arg7[%c0_39, %c0_40] : memref<1x256xf32, #tpu.memory_space<vmem>>, vector<1x256xf32>
      tpu.vector_store %arg7[%c0_39, %c0_40], %93 {strides = array<i32>} : memref<1x256xf32, #tpu.memory_space<vmem>>, vector<1x256xf32>,
      %cst_41 = arith.constant 0.000000e+00 : f32
      %95 = vector.broadcast %cst_41 : f32 to vector<1x256xf32>
      %c0_42 = arith.constant 0 : index
      %c0_43 = arith.constant 0 : index
      %96 = vector.load %arg8[%c0_42, %c0_43] : memref<1x256xf32, #tpu.memory_space<vmem>>, vector<1x256xf32>
      tpu.vector_store %arg8[%c0_42, %c0_43], %95 {strides = array<i32>} : memref<1x256xf32, #tpu.memory_space<vmem>>, vector<1x256xf32>,
      %cst_44 = arith.constant 0.000000e+00 : f32
      %97 = vector.broadcast %cst_44 : f32 to vector<1x256xf32>
      %c0_45 = arith.constant 0 : index
      %c0_46 = arith.constant 0 : index
      %98 = vector.load %arg9[%c0_45, %c0_46] : memref<1x256xf32, #tpu.memory_space<vmem>>, vector<1x256xf32>
      tpu.vector_store %arg9[%c0_45, %c0_46], %97 {strides = array<i32>} : memref<1x256xf32, #tpu.memory_space<vmem>>, vector<1x256xf32>,
    } else {
    }
    %c0 = arith.constant 0 : index
    %c0_1 = arith.constant 0 : index
    %c0_2 = arith.constant 0 : index
    %3 = vector.load %arg2[%c0, %c0_1, %c0_2] : memref<1x12x256xf32, #tpu.memory_space<vmem>>, vector<1x12x256xf32>
    %4 = vector.shape_cast %3 : vector<1x12x256xf32> to vector<12x256xf32>
    %c0_3 = arith.constant 0 : index
    %c0_4 = arith.constant 0 : index
    %c0_5 = arith.constant 0 : index
    %5 = vector.load %arg3[%c0_3, %c0_4, %c0_5] : memref<1x1x256xi32, #tpu.memory_space<vmem>>, vector<1x1x256xi32>
    %6 = vector.shape_cast %5 : vector<1x1x256xi32> to vector<1x256xi32>
    %cst = arith.constant dense<0xFF800000> : vector<256xf32>
    %7 = vector.multi_reduction <maximumf>, %4, %cst [0] : vector<12x256xf32> to vector<256xf32>
    %8 = vector.shape_cast %7 : vector<256xf32> to vector<1x256xf32>
    %9 = vector.broadcast %8 : vector<1x256xf32> to vector<12x256xf32>
    %10 = arith.subf %4, %9 : vector<12x256xf32>
    %11 = math.exp %10 : vector<12x256xf32>
    %cst_6 = arith.constant dense<0.000000e+00> : vector<256xf32>
    %12 = vector.multi_reduction <add>, %11, %cst_6 [0] : vector<12x256xf32> to vector<256xf32>
    %13 = vector.shape_cast %12 : vector<256xf32> to vector<1x256xf32>
    %14 = math.log %13 : vector<1x256xf32>
    %15 = arith.addf %8, %14 : vector<1x256xf32>
    %16 = tpu.iota {dimensions = array<i32: 0>} : vector<12x256xi32>
    %17 = vector.broadcast %6 : vector<1x256xi32> to vector<12x256xi32>
    %18 = arith.cmpi eq, %16, %17 : vector<12x256xi32>
    %19 = arith.extui %18 : vector<12x256xi1> to vector<12x256xi32>
    %20 = arith.sitofp %19 : vector<12x256xi32> to vector<12x256xf32>
    %21 = arith.mulf %20, %4 : vector<12x256xf32>
    %cst_7 = arith.constant dense<0.000000e+00> : vector<256xf32>
    %22 = vector.multi_reduction <add>, %21, %cst_7 [0] : vector<12x256xf32> to vector<256xf32>
    %23 = vector.shape_cast %22 : vector<256xf32> to vector<1x256xf32>
    %cst_8 = arith.constant 0.000000e+00 : f32
    %24 = vector.broadcast %cst_8 : f32 to vector<1x256xf32>
    %c0_i32_9 = arith.constant 0 : i32
    %25 = vector.broadcast %c0_i32_9 : i32 to vector<1x256xi32>
    %26 = arith.cmpi eq, %6, %25 : vector<1x256xi32>
    %cst_10 = arith.constant 3.051080e-04 : f32
    %27 = vector.broadcast %cst_10 : f32 to vector<1x256xf32>
    %28 = arith.select %26, %27, %24 : vector<1x256xi1>, vector<1x256xf32>
    %c1_i32 = arith.constant 1 : i32
    %29 = vector.broadcast %c1_i32 : i32 to vector<1x256xi32>
    %30 = arith.cmpi eq, %6, %29 : vector<1x256xi32>
    %cst_11 = arith.constant 0.362784237 : f32
    %31 = vector.broadcast %cst_11 : f32 to vector<1x256xf32>
    %32 = arith.select %30, %31, %28 : vector<1x256xi1>, vector<1x256xf32>
    %c2_i32 = arith.constant 2 : i32
    %33 = vector.broadcast %c2_i32 : i32 to vector<1x256xi32>
    %34 = arith.cmpi eq, %6, %33 : vector<1x256xi32>
    %cst_12 = arith.constant 0.00967408157 : f32
    %35 = vector.broadcast %cst_12 : f32 to vector<1x256xf32>
    %36 = arith.select %34, %35, %32 : vector<1x256xi1>, vector<1x256xf32>
    %c3_i32 = arith.constant 3 : i32
    %37 = vector.broadcast %c3_i32 : i32 to vector<1x256xi32>
    %38 = arith.cmpi eq, %6, %37 : vector<1x256xi32>
    %cst_13 = arith.constant 0.00234700833 : f32
    %39 = vector.broadcast %cst_13 : f32 to vector<1x256xf32>
    %40 = arith.select %38, %39, %36 : vector<1x256xi1>, vector<1x256xf32>
    %c4_i32 = arith.constant 4 : i32
    %41 = vector.broadcast %c4_i32 : i32 to vector<1x256xi32>
    %42 = arith.cmpi eq, %6, %41 : vector<1x256xi32>
    %cst_14 = arith.constant 0.0293149296 : f32
    %43 = vector.broadcast %cst_14 : f32 to vector<1x256xf32>
    %44 = arith.select %42, %43, %40 : vector<1x256xi1>, vector<1x256xf32>
    %c5_i32 = arith.constant 5 : i32
    %45 = vector.broadcast %c5_i32 : i32 to vector<1x256xi32>
    %46 = arith.cmpi eq, %6, %45 : vector<1x256xi32>
    %cst_15 = arith.constant 0.0236560591 : f32
    %47 = vector.broadcast %cst_15 : f32 to vector<1x256xf32>
    %48 = arith.select %46, %47, %44 : vector<1x256xi1>, vector<1x256xf32>
    %c6_i32 = arith.constant 6 : i32
    %49 = vector.broadcast %c6_i32 : i32 to vector<1x256xi32>
    %50 = arith.cmpi eq, %6, %49 : vector<1x256xi32>
    %cst_16 = arith.constant 0.0269401092 : f32
    %51 = vector.broadcast %cst_16 : f32 to vector<1x256xf32>
    %52 = arith.select %50, %51, %48 : vector<1x256xi1>, vector<1x256xf32>
    %c7_i32 = arith.constant 7 : i32
    %53 = vector.broadcast %c7_i32 : i32 to vector<1x256xi32>
    %54 = arith.cmpi eq, %6, %53 : vector<1x256xi32>
    %cst_17 = arith.constant 0.00757726608 : f32
    %55 = vector.broadcast %cst_17 : f32 to vector<1x256xf32>
    %56 = arith.select %54, %55, %52 : vector<1x256xi1>, vector<1x256xf32>
    %c8_i32 = arith.constant 8 : i32
    %57 = vector.broadcast %c8_i32 : i32 to vector<1x256xi32>
    %58 = arith.cmpi eq, %6, %57 : vector<1x256xi32>
    %cst_18 = arith.constant 0.0142296841 : f32
    %59 = vector.broadcast %cst_18 : f32 to vector<1x256xf32>
    %60 = arith.select %58, %59, %56 : vector<1x256xi1>, vector<1x256xf32>
    %c9_i32 = arith.constant 9 : i32
    %61 = vector.broadcast %c9_i32 : i32 to vector<1x256xi32>
    %62 = arith.cmpi eq, %6, %61 : vector<1x256xi32>
    %cst_19 = arith.constant 0.00180541608 : f32
    %63 = vector.broadcast %cst_19 : f32 to vector<1x256xf32>
    %64 = arith.select %62, %63, %60 : vector<1x256xi1>, vector<1x256xf32>
    %c10_i32 = arith.constant 10 : i32
    %65 = vector.broadcast %c10_i32 : i32 to vector<1x256xi32>
    %66 = arith.cmpi eq, %6, %65 : vector<1x256xi32>
    %cst_20 = arith.constant 0.480674624 : f32
    %67 = vector.broadcast %cst_20 : f32 to vector<1x256xf32>
    %68 = arith.select %66, %67, %64 : vector<1x256xi1>, vector<1x256xf32>
    %c11_i32 = arith.constant 11 : i32
    %69 = vector.broadcast %c11_i32 : i32 to vector<1x256xi32>
    %70 = arith.cmpi eq, %6, %69 : vector<1x256xi32>
    %cst_21 = arith.constant 0.0406914651 : f32
    %71 = vector.broadcast %cst_21 : f32 to vector<1x256xf32>
    %72 = arith.select %70, %71, %68 : vector<1x256xi1>, vector<1x256xf32>
    %c0_22 = arith.constant 0 : index
    %c0_23 = arith.constant 0 : index
    %73 = vector.load %arg7[%c0_22, %c0_23] : memref<1x256xf32, #tpu.memory_space<vmem>>, vector<1x256xf32>
    %74 = arith.subf %15, %23 : vector<1x256xf32>
    %75 = arith.mulf %72, %74 : vector<1x256xf32>
    %76 = arith.addf %73, %75 : vector<1x256xf32>
    %c0_24 = arith.constant 0 : index
    %c0_25 = arith.constant 0 : index
    %77 = vector.load %arg7[%c0_24, %c0_25] : memref<1x256xf32, #tpu.memory_space<vmem>>, vector<1x256xf32>
    tpu.vector_store %arg7[%c0_24, %c0_25], %76 {strides = array<i32>} : memref<1x256xf32, #tpu.memory_space<vmem>>, vector<1x256xf32>,
    %c0_26 = arith.constant 0 : index
    %c0_27 = arith.constant 0 : index
    %78 = vector.load %arg8[%c0_26, %c0_27] : memref<1x256xf32, #tpu.memory_space<vmem>>, vector<1x256xf32>
    %79 = arith.addf %78, %72 : vector<1x256xf32>
    %c0_28 = arith.constant 0 : index
    %c0_29 = arith.constant 0 : index
    %80 = vector.load %arg8[%c0_28, %c0_29] : memref<1x256xf32, #tpu.memory_space<vmem>>, vector<1x256xf32>
    tpu.vector_store %arg8[%c0_28, %c0_29], %79 {strides = array<i32>} : memref<1x256xf32, #tpu.memory_space<vmem>>, vector<1x256xf32>,
    %81 = arith.subf %23, %15 : vector<1x256xf32>
    %82 = math.exp %81 : vector<1x256xf32>
    %c0_30 = arith.constant 0 : index
    %c0_31 = arith.constant 0 : index
    %83 = vector.load %arg9[%c0_30, %c0_31] : memref<1x256xf32, #tpu.memory_space<vmem>>, vector<1x256xf32>
    %cst_32 = arith.constant 1.000000e+00 : f32
    %84 = vector.broadcast %cst_32 : f32 to vector<1x256xf32>
    %85 = arith.subf %84, %82 : vector<1x256xf32>
    %cst_33 = arith.constant 2.000000e+00 : f32
    %86 = vector.broadcast %cst_33 : f32 to vector<1x256xf32>
    %87 = arith.mulf %86, %85 : vector<1x256xf32>
    %88 = arith.addf %83, %87 : vector<1x256xf32>
    %c0_34 = arith.constant 0 : index
    %c0_35 = arith.constant 0 : index
    %89 = vector.load %arg9[%c0_34, %c0_35] : memref<1x256xf32, #tpu.memory_space<vmem>>, vector<1x256xf32>
    tpu.vector_store %arg9[%c0_34, %c0_35], %88 {strides = array<i32>} : memref<1x256xf32, #tpu.memory_space<vmem>>, vector<1x256xf32>,
    %c0_i32_36 = arith.constant 0 : i32
    %90 = arith.cmpi eq, %arg1, %c0_i32_36 : i32
    %91 = arith.extui %90 : i1 to i32
    %c0_i32_37 = arith.constant 0 : i32
    %92 = arith.cmpi ne, %91, %c0_i32_37 : i32
    scf.if %92 {
      %c0_38 = arith.constant 0 : index
      %c0_39 = arith.constant 0 : index
      %93 = vector.load %arg7[%c0_38, %c0_39] : memref<1x256xf32, #tpu.memory_space<vmem>>, vector<1x256xf32>
      %94 = vector.shape_cast %93 : vector<1x256xf32> to vector<1x1x256xf32>
      %cst_40 = arith.constant dense<0.000000e+00> : vector<1xf32>
      %95 = vector.multi_reduction <add>, %94, %cst_40 [1, 2] : vector<1x1x256xf32> to vector<1xf32>
      %96 = vector.shape_cast %95 : vector<1xf32> to vector<1x1x1xf32>
      %97 = vector.extract %96[0, 0, 0] : f32 from vector<1x1x1xf32>
      %98 = vector.broadcast %97 : f32 to vector<1x1xf32>
      %c0_41 = arith.constant 0 : index
      %c0_42 = arith.constant 0 : index
      %c0_43 = arith.constant 0 : index
      %99 = vector.load %arg4[%c0_41, %c0_42, %c0_43] : memref<1x1x1xf32, #tpu.memory_space<vmem>>, vector<1x1x1xf32>
      %100 = vector.shape_cast %99 : vector<1x1x1xf32> to vector<1x1xf32>
      %101 = vector.shape_cast %98 : vector<1x1xf32> to vector<1x1x1xf32>
      tpu.vector_store %arg4[%c0_41, %c0_42, %c0_43], %101 {strides = array<i32>} : memref<1x1x1xf32, #tpu.memory_space<vmem>>, vector<1x1x1xf32>,
      %c0_44 = arith.constant 0 : index
      %c0_45 = arith.constant 0 : index
      %102 = vector.load %arg8[%c0_44, %c0_45] : memref<1x256xf32, #tpu.memory_space<vmem>>, vector<1x256xf32>
      %103 = vector.shape_cast %102 : vector<1x256xf32> to vector<1x1x256xf32>
      %cst_46 = arith.constant dense<0.000000e+00> : vector<1xf32>
      %104 = vector.multi_reduction <add>, %103, %cst_46 [1, 2] : vector<1x1x256xf32> to vector<1xf32>
      %105 = vector.shape_cast %104 : vector<1xf32> to vector<1x1x1xf32>
      %106 = vector.extract %105[0, 0, 0] : f32 from vector<1x1x1xf32>
      %107 = vector.broadcast %106 : f32 to vector<1x1xf32>
      %c0_47 = arith.constant 0 : index
      %c0_48 = arith.constant 0 : index
      %c0_49 = arith.constant 0 : index
      %108 = vector.load %arg5[%c0_47, %c0_48, %c0_49] : memref<1x1x1xf32, #tpu.memory_space<vmem>>, vector<1x1x1xf32>
      %109 = vector.shape_cast %108 : vector<1x1x1xf32> to vector<1x1xf32>
      %110 = vector.shape_cast %107 : vector<1x1xf32> to vector<1x1x1xf32>
      tpu.vector_store %arg5[%c0_47, %c0_48, %c0_49], %110 {strides = array<i32>} : memref<1x1x1xf32, #tpu.memory_space<vmem>>, vector<1x1x1xf32>,
      %c0_50 = arith.constant 0 : index
      %c0_51 = arith.constant 0 : index
      %111 = vector.load %arg9[%c0_50, %c0_51] : memref<1x256xf32, #tpu.memory_space<vmem>>, vector<1x256xf32>
      %112 = vector.shape_cast %111 : vector<1x256xf32> to vector<1x1x256xf32>
      %cst_52 = arith.constant dense<0.000000e+00> : vector<1xf32>
      %113 = vector.multi_reduction <add>, %112, %cst_52 [1, 2] : vector<1x1x256xf32> to vector<1xf32>
      %114 = vector.shape_cast %113 : vector<1xf32> to vector<1x1x1xf32>
      %115 = vector.extract %114[0, 0, 0] : f32 from vector<1x1x1xf32>
      %116 = vector.broadcast %115 : f32 to vector<1x1xf32>
      %c0_53 = arith.constant 0 : index
      %c0_54 = arith.constant 0 : index
      %c0_55 = arith.constant 0 : index
      %117 = vector.load %arg6[%c0_53, %c0_54, %c0_55] : memref<1x1x1xf32, #tpu.memory_space<vmem>>, vector<1x1x1xf32>
      %118 = vector.shape_cast %117 : vector<1x1x1xf32> to vector<1x1xf32>
      %119 = vector.shape_cast %116 : vector<1x1xf32> to vector<1x1x1xf32>
      tpu.vector_store %arg6[%c0_53, %c0_54, %c0_55], %119 {strides = array<i32>} : memref<1x1x1xf32, #tpu.memory_space<vmem>>, vector<1x1x1xf32>,
    } else {
    }
    return
  }
  func.func @transform_0(%arg0: i32, %arg1: i32) -> (i32, i32, i32) {
    %c0_i32 = arith.constant 0 : i32
    %c0_i32_0 = arith.constant 0 : i32
    return %arg0, %c0_i32, %arg1 : i32, i32, i32
  }
  func.func @transform_1(%arg0: i32, %arg1: i32) -> (i32, i32, i32) {
    %c0_i32 = arith.constant 0 : i32
    %c0_i32_0 = arith.constant 0 : i32
    return %arg0, %c0_i32, %arg1 : i32, i32, i32
  }
  func.func @transform_2(%arg0: i32, %arg1: i32) -> (i32, i32, i32) {
    %c0_i32 = arith.constant 0 : i32
    %c0_i32_0 = arith.constant 0 : i32
    %c0_i32_1 = arith.constant 0 : i32
    return %arg0, %c0_i32, %c0_i32_0 : i32, i32, i32
  }
  func.func @transform_3(%arg0: i32, %arg1: i32) -> (i32, i32, i32) {
    %c0_i32 = arith.constant 0 : i32
    %c0_i32_0 = arith.constant 0 : i32
    %c0_i32_1 = arith.constant 0 : i32
    return %arg0, %c0_i32, %c0_i32_0 : i32, i32, i32
  }
  func.func @transform_4(%arg0: i32, %arg1: i32) -> (i32, i32, i32) {
    %c0_i32 = arith.constant 0 : i32
    %c0_i32_0 = arith.constant 0 : i32
    %c0_i32_1 = arith.constant 0 : i32
    return %arg0, %c0_i32, %c0_i32_0 : i32, i32, i32
  }
}

</mosaic_0001>

<bundles_post_ra>
// kernel: tpu_custom_call.1
= control target key start
LH: loop header
LB: loop body
LE: loop exit
PB: predicated region body
PF: predicated region fallthrough
CT: control target
= control target key end

     0   :  { %s791_s15 = smov 0   ;;  %s793_s16 = smov 0   ;;  %s930_s0 = inlined_call_operand.vmem [shape: f32[2,12,256], index: 0, kind: input, shape index: {}]   ;;  %s931_s1 = inlined_call_operand.vmem [shape: s32[2,1,256], index: 1, kind: input, shape index: {}]   ;;  %s932_s2 = inlined_call_operand.vmem [shape: f32[2,1,1], index: 2, kind: output, shape index: {0}]   ;;  %s933_s3 = inlined_call_operand.vmem [shape: f32[2,1,1], index: 3, kind: output, shape index: {1}]   ;;  %s934_s4 = inlined_call_operand.vmem [shape: f32[2,1,1], index: 4, kind: output, shape index: {2}]  }
   0x1   :  { %s795_s17 = smov 0  }
   0x2 LB: > { %s27_s18 = sadd.s32 1, %s758_s16  ;;  %p681_p0 = scmp.ge.s32.totalorder %s762_s17, 1  ;;  %s762_s17 = sphi %s795_s17, %s15_s17   ;;  %s758_s16 = sphi %s793_s16, %s938_s16   ;;  %s754_s15 = sphi %s791_s15, %s937_s15  }
   0x3   : > { %p29_p1 = scmp.ge.s32.totalorder %s27_s18, 2  ;;  %p202_p2 = scmp.lt.s32.totalorder %s762_s17, 3 }
   0x5   : > { %s940_s18 = smov (%p29_p1, %s27_s18), 0  ;;  %p203_p3 = pnand %p681_p0, %p202_p2 }
   0x6   : > { %p245_p4 = scmp.lt.s32.totalorder (!%p203_p3), %s754_s15, 1  ;;  %v276_v0 = vlaneseq (!%p203_p3)  ;;  %v764_v2 = vmov (!%p203_p3), 0.0   ;;  %vm288_vm1 = vcmask (!%p203_p3), 1043456  }
   0x7   : > { %206 = sbr.rel (%p203_p3) target bundleno = 327 (0x147), region = 28 }
   0x8   : > { %vm811_vm0 = vcmp.lt.s32.totalorder (!%p203_p3), %v276_v0, 256  ;;  %v847_v21 = vshrl.u32 (!%p203_p3), %v276_v0, 7 }
   0x9   : > { %280 = vst.msk [vmem:[#allocation2] sm:$0x3] (!%p203_p3), %vm811_vm0, %v764_v2  ;;  %281 = vst.msk [vmem:[#allocation3] sm:$0x3] (!%p203_p3), %vm811_vm0, %v764_v2 }
   0xa   : > { %282 = vst.msk [vmem:[#allocation4] sm:$0x3] (!%p203_p3), %vm811_vm0, %v764_v2  ;;  %v852_v30 = vsub.s32 (!%p203_p3), 0, %v847_v21  ;;  %v857_v33 = vsub.s32 (!%p203_p3), 1, %v847_v21  ;;  %v341_v37 = vadd.s32 (!%p203_p3), 8, %v847_v21 }
   0xe   : > { %s942_s15 = smov (!%p245_p4, %s754_s15), 1 }
   0xf   : > { %s691_s19 = sshll.u32 %s942_s15, 5  ;;  %s684_s20 = sshll.u32 %s942_s15, 1 }
  0x10   : > { %s252_s23 = scalar_lea.vmem %s930_s0, %s691_s19  ;;  %s261_s26 = scalar_lea.vmem %s931_s1, %s684_s20  ;;  %v434_v41 = vld [vmem:[#allocation3] sm:$0x3] }
  0x11   : > { %v829_v3 = vld [vmem:[%s252_s23] sm:$0xff]  ;;  %v831_v4 = vld [vmem:[%s252_s23 + $0x8] sm:$0xff]  ;;  %v833_v5 = vld [vmem:[%s252_s23 + $0x10] sm:$0xf]  ;;  %s265_s29 = scalar_lea.vmem %s932_s2, %s942_s15  ;;  %s268_s7 = scalar_lea.vmem %s933_s3, %s942_s15 }
  0x12   : > { %v838_v6 = vld [vmem:[%s252_s23 + $0x18] sm:$0xf]  ;;  %v289_v7 = vsel %vm288_vm1, %v833_v5, -inf  ;;  %v287_v11 = vld [vmem:[%s261_s26] sm:$0x3]  ;;  %s271_s11 = scalar_lea.vmem %s934_s4, %s942_s15 }
  0x13   : > { %v290_v8 = vmax.f32 %v829_v3, %v289_v7  ;;  %v297_v9 = vsel %vm288_vm1, %v838_v6, -inf  ;;  %vm382_vm2 = vcmp.eq.s32.totalorder %v287_v11, 0  ;;  %vm384_vm3 = vcmp.eq.s32.totalorder %v287_v11, 1 }
  0x14   : > { %v298_v10 = vmax.f32 %v831_v4, %v297_v9  ;;  %vm386_vm4 = vcmp.eq.s32.totalorder %v287_v11, 2  ;;  %v383_v17 = vsel %vm382_vm2, 0.000305108, %v764_v2  ;;  %vm388_vm5 = vcmp.eq.s32.totalorder %v287_v11, 3 }
  0x15   : > { %v291_v12 = vrot.slane %v290_v8, 4  ;;  %v385_v19 = vsel %vm384_vm3, 0.36278424, %v383_v17  ;;  %vm390_vm6 = vcmp.eq.s32.totalorder %v287_v11, 4  ;;  %vm392_vm7 = vcmp.eq.s32.totalorder %v287_v11, 5 }
  0x16   : > { %v299_v13 = vrot.slane %v298_v10, 4  ;;  %v387_v22 = vsel %vm386_vm4, 0.009674082, %v385_v19  ;;  %vm394_vm8 = vcmp.eq.s32.totalorder %v287_v11, 6  ;;  %vm396_vm9 = vcmp.eq.s32.totalorder %v287_v11, 7 }
  0x17   : > { %v292_v14 = vmax.f32 %v290_v8, %v291_v12  ;;  %v389_v24 = vsel %vm388_vm5, 0.0023470083, %v387_v22  ;;  %vm398_vm10 = vcmp.eq.s32.totalorder %v287_v11, 8  ;;  %vm400_vm11 = vcmp.eq.s32.totalorder %v287_v11, 9 }
  0x18   : > { %v300_v15 = vmax.f32 %v298_v10, %v299_v13  ;;  %v391_v26 = vsel %vm390_vm6, 0.02931493, %v389_v24  ;;  %vm402_vm12 = vcmp.eq.s32.totalorder %v287_v11, 10  ;;  %v345_v44 = vrot.slane %v287_v11, %v852_v30 }
  0x19   : > { %v293_v16 = vrot.slane %v292_v14, 2  ;;  %v393_v28 = vsel %vm392_vm7, 0.023656059, %v391_v26  ;;  %vm404_vm13 = vcmp.eq.s32.totalorder %v287_v11, 11  ;;  %v349_v47 = vrot.slane %v287_v11, %v857_v33 }
  0x1a   : > { %v301_v18 = vrot.slane %v300_v15, 2  ;;  %v395_v31 = vsel %vm394_vm8, 0.02694011, %v393_v28  ;;  %vm352_vm14 = vcmp.eq.s32.totalorder %v341_v37, %v345_v44  ;;  %vm350_vm2 = vcmp.eq.s32.totalorder %v847_v21, %v345_v44 }
  0x1b   : > { %v294_v20 = vmax.f32 %v292_v14, %v293_v16  ;;  %v397_v34 = vsel %vm396_vm9, 0.007577266, %v395_v31  ;;  %vm353_vm15 = vcmp.eq.s32.totalorder %v341_v37, %v349_v47  ;;  %v687_v52 = vsel %vm352_vm14, 1.0, %v764_v2 }
  0x1c   : > { %v302_v23 = vmax.f32 %v300_v15, %v301_v18  ;;  %v399_v40 = vsel %vm398_vm10, 0.014229684, %v397_v34  ;;  %vm351_vm3 = vcmp.eq.s32.totalorder %v847_v21, %v349_v47  ;;  %v688_v53 = vsel %vm353_vm15, 1.0, %v764_v2 }
  0x1d   : > { %v295_v25 = vrot.slane %v294_v20, 1  ;;  %v401_v48 = vsel %vm400_vm11, 0.0018054161, %v399_v40  ;;  %v685_v54 = vsel %vm350_vm2, 1.0, %v764_v2  ;;  %v364_v55 = vmul.f32 %v687_v52, %v833_v5 }
  0x1e   : > { %v303_v27 = vrot.slane %v302_v23, 1  ;;  %v403_v49 = vsel %vm402_vm12, 0.48067462, %v401_v48  ;;  %v686_v56 = vsel %vm351_vm3, 1.0, %v764_v2  ;;  %v365_v57 = vmul.f32 %v688_v53, %v838_v6 }
  0x1f   : > { %v849_v29 = vmax.f32 %v294_v20, %v295_v25  ;;  %v870_v50 = vsel %vm404_vm13, 0.040691465, %v403_v49  ;;  %v362_v60 = vmul.f32 %v685_v54, %v829_v3  ;;  %v363_v62 = vmul.f32 %v686_v56, %v831_v4 }
  0x20   : > { %v854_v32 = vmax.f32 %v302_v23, %v303_v27  ;;  %v435_v51 = vadd.f32 %v434_v41, %v870_v50  ;;  %v366_v63 = vsel %vm288_vm1, %v364_v55, 0.0  ;;  %v374_v8 = vsel %vm288_vm1, %v365_v57, 0.0 }
  0x21   : > { %v305_v35 = vsub.f32 %v829_v3, %v849_v29  ;;  %v307_v36 = vsub.f32 %v833_v5, %v849_v29  ;;  %v367_v10 = vadd.f32 %v366_v63, %v362_v60  ;;  %v375_v11 = vadd.f32 %v374_v8, %v363_v62 }
  0x22   : > { %v306_v38 = vsub.f32 %v831_v4, %v854_v32  ;;  %v308_v39 = vsub.f32 %v838_v6, %v854_v32  ;;  %436 = vst.msk [vmem:[#allocation3] sm:$0x3] %vm811_vm0, %v435_v51 }
  0x23   : > { %v309_v42 = vmul.f32 1.442695, %v305_v35  ;;  %v313_v43 = vmul.f32 1.442695, %v307_v36  ;;  %v368_v14 = vrot.slane %v367_v10, 4  ;;  %v376_v4 = vrot.slane %v375_v11, 4 }
  0x24   : > { %v311_v45 = vmul.f32 1.442695, %v306_v38  ;;  %v315_v46 = vmul.f32 1.442695, %v308_v39  ;;  %v765_v36 = vmov 1966171168  }
  0x25   : > { %724 = vpow2.f32 %v309_v42  ;;  %v369_v19 = vadd.f32 %v368_v14, %v367_v10  ;;  %v377_v22 = vadd.f32 %v376_v4, %v375_v11  ;;  %v413_v37 = vunpack.c.l.s4 %v765_v36 }
  0x26   : > { %726 = vpow2.f32 %v311_v45 }
  0x27   : > { %728 = vpow2.f32 %v313_v43  ;;  %v370_v26 = vrot.slane %v369_v19, 2  ;;  %v378_v27 = vrot.slane %v377_v22, 2  ;;  %v414_v44 = vunpack.c.0.s8 %v413_v37 }
  0x28   : > { %730 = vpow2.f32 %v315_v46 }
  0x29   : > { %v371_v28 = vadd.f32 %v370_v26, %v369_v19  ;;  %v379_v31 = vadd.f32 %v378_v27, %v377_v22  ;;  %v417_v51 = vsub.s32 %v414_v44, %v847_v21  ;;  %v499_v21 = vld [vmem:[#allocation3] sm:$0x3] }
  0x2a   : > { %v508_v8 = vrot.slane %v499_v21, %v857_v33 }
  0x2b   : > { %v372_v34 = vrot.slane %v371_v28, 1  ;;  %v380_v35 = vrot.slane %v379_v31, 1 }
  0x2d   : > { %v373_v41 = vadd.f32 %v372_v34, %v371_v28  ;;  %v381_v43 = vadd.f32 %v380_v35, %v379_v31 }
  0x2f   : > { %v725_v58 = vpop.eup %724 }
  0x30   : > { %v727_v59 = vpop.eup %726 }
  0x31   : > { %v729_v61 = vpop.eup %728 }
  0x32   : > { %v731_v0 = vpop.eup %730  ;;  %v317_v7 = vsel %vm288_vm1, %v729_v61, 0.0 }
  0x33   : > { %v318_v9 = vadd.f32 %v725_v58, %v317_v7  ;;  %v325_v5 = vsel %vm288_vm1, %v731_v0, 0.0  ;;  %v406_v58 = vld [vmem:[#allocation2] sm:$0x3]  ;;  %v504_v7 = vrot.slane %v499_v21, %v852_v30  ;;  %vm483_vm1 = vcmask 1040384  }
  0x34   : > { %v326_v2 = vadd.f32 %v727_v59, %v325_v5 }
  0x35   : > { %v319_v6 = vrot.slane %v318_v9, 4 }
  0x36   : > { %v327_v12 = vrot.slane %v326_v2, 4 }
  0x37   : > { %v320_v13 = vadd.f32 %v319_v6, %v318_v9 }
  0x38   : > { %v328_v3 = vadd.f32 %v327_v12, %v326_v2  ;;  %v511_v12 = vsel %vm483_vm1, %v504_v7, 0.0 }
  0x39   : > { %v321_v15 = vrot.slane %v320_v13, 2 }
  0x3a   : > { %v329_v16 = vrot.slane %v328_v3, 2 }
  0x3b   : > { %v322_v17 = vadd.f32 %v321_v15, %v320_v13  ;;  %v512_v13 = vsel %vm483_vm1, %v508_v8, 0.0 }
  0x3c   : > { %v330_v18 = vadd.f32 %v329_v16, %v328_v3  ;;  %v443_v3 = vld [vmem:[#allocation4] sm:$0x3]  ;;  %v513_v4 = vadd.f32 %v512_v13, %v511_v12 }
  0x3d   : > { %v323_v20 = vrot.slane %v322_v17, 1 }
  0x3e   : > { %v331_v23 = vrot.slane %v330_v18, 1 }
  0x3f   : > { %v324_v24 = vadd.f32 %v323_v20, %v322_v17 }
  0x40   : > { %v332_v25 = vadd.f32 %v331_v23, %v330_v18 }
  0x41   : > { %732 = vlog2.f32 %v324_v24 }
  0x42   : > { %734 = vlog2.f32 %v332_v25 }
  0x4b   : > { %v733_v38 = vpop.eup %732 }
  0x4c   : > { %v735_v39 = vpop.eup %734  ;;  %v334_v40 = vmul.f32 0.6931472, %v733_v38 }
  0x4d   : > { %v336_v42 = vmul.f32 0.6931472, %v735_v39 }
  0x4e   : > { %v337_v45 = vadd.f32 %v334_v40, %v849_v29 }
  0x4f   : > { %v338_v46 = vadd.f32 %v336_v42, %v854_v32 }
  0x50   : > { %v407_v47 = vsub.f32 %v337_v45, %v373_v41  ;;  %v437_v48 = vsub.f32 %v373_v41, %v337_v45 }
  0x51   : > { %v408_v49 = vsub.f32 %v338_v46, %v381_v43  ;;  %v438_v52 = vsub.f32 %v381_v43, %v338_v46 }
  0x52   : > { %v439_v53 = vmul.f32 1.442695, %v437_v48 }
  0x53   : > { %v411_v54 = vcombine.low %v407_v47, %v408_v49  ;;  %v441_v55 = vmul.f32 1.442695, %v438_v52 }
  0x54   : > { %736 = vpow2.f32 %v439_v53 }
  0x55   : > { %v418_v56 = vrot.slane %v411_v54, %v417_v51  ;;  %738 = vpow2.f32 %v441_v55 }
  0x57   : > { %v425_v57 = vrot.slane %v418_v56, %v417_v51 }
  0x59   : > { %v427_v59 = vmul.f32 %v425_v57, %v870_v50 }
  0x5b   : > { %v428_v60 = vadd.f32 %v427_v59, %v406_v58 }
  0x5d   : > { %433 = vst.msk [vmem:[#allocation2] sm:$0x3] %vm811_vm0, %v428_v60 }
  0x5e   : > { %v737_v29 = vpop.eup %736 }
  0x5f   : > { %v739_v32 = vpop.eup %738  ;;  %v444_v61 = vsub.f32 1.0, %v737_v29 }
  0x60   : > { %v445_v62 = vsub.f32 1.0, %v739_v32 }
  0x61   : > { %v446_v63 = vmul.f32 2.0, %v444_v61 }
  0x62   : > { %v447_v0 = vmul.f32 2.0, %v445_v62 }
  0x64   : > { %v450_v9 = vcombine.low %v446_v63, %v447_v0  ;;  %v471_v5 = vld [vmem:[#allocation2] sm:$0x3] }
  0x65   : > { %v476_v50 = vrot.slane %v471_v5, %v852_v30  ;;  %v480_v2 = vrot.slane %v471_v5, %v857_v33 }
  0x66   : > { %v457_v10 = vrot.slane %v450_v9, %v417_v51 }
  0x67   : > { %v484_v6 = vsel %vm483_vm1, %v476_v50, 0.0  ;;  %v485_v11 = vsel %vm483_vm1, %v480_v2, 0.0 }
  0x68   : > { %v486_v14 = vadd.f32 %v485_v11, %v484_v6  ;;  %v464_v15 = vrot.slane %v457_v10, %v417_v51 }
  0x6a   : > { %487 = vadd.xlane.f32.xlu0 %v486_v14  ;;  %v466_v16 = vadd.f32 %v464_v15, %v443_v3 }
  0x6c   : > { %467 = vst.msk [vmem:[#allocation4] sm:$0x3] %vm811_vm0, %v466_v16  ;;  %vm497_vm0 = vcmask 0  }
  0x6e   : > { %514 = vadd.xlane.f32.xlu0 %v513_v4 }
  0x73   : > { %v525_v17 = vld [vmem:[#allocation4] sm:$0x3] }
  0x74   : > { %v530_v18 = vrot.slane %v525_v17, %v852_v30  ;;  %v534_v19 = vrot.slane %v525_v17, %v857_v33 }
  0x76   : > { %v537_v20 = vsel %vm483_vm1, %v530_v18, 0.0  ;;  %v538_v22 = vsel %vm483_vm1, %v534_v19, 0.0 }
  0x77   : > { %v539_v23 = vadd.f32 %v538_v22, %v537_v20 }
  0x79   : > { %540 = vadd.xlane.f32.xlu1 %v539_v23 }
  0xf7   : > { %v488_v24 = vpop.xlane.xlu0 %487 }
  0xf8   : > { %v489_v25 = vrot.slane %v488_v24, 4 }
  0xfa   : > { %v490_v26 = vadd.f32 %v489_v25, %v488_v24 }
  0xfb   : > { %v515_v27 = vpop.xlane.xlu0 %514 }
  0xfc   : > { %v491_v28 = vrot.slane %v490_v26, 2  ;;  %v516_v31 = vrot.slane %v515_v27, 4 }
  0xfe   : > { %v517_v1 = vadd.f32 %v516_v31, %v515_v27  ;;  %v492_v34 = vadd.f32 %v491_v28, %v490_v26 }
 0x100   : > { %v518_v35 = vrot.slane %v517_v1, 2  ;;  %v493_v36 = vrot.slane %v492_v34, 1 }
 0x102   : > { %v519_v30 = vadd.f32 %v518_v35, %v517_v1  ;;  %v494_v37 = vadd.f32 %v493_v36, %v492_v34 }
 0x104   : > { %692 = vpush %v494_v37  ;;  %v520_v33 = vrot.slane %v519_v30, 1 }
 0x106   : > { %v541_v38 = vpop.xlane.xlu1 %540  ;;  %v521_v39 = vadd.f32 %v520_v33, %v519_v30 }
 0x107   : > { %v542_v40 = vrot.slane %v541_v38, 4 }
 0x108   : > { %694 = vpush %v521_v39 }
 0x109   : > { %v543_v41 = vadd.f32 %v542_v40, %v541_v38 }
 0x10b   : > { %v544_v42 = vrot.slane %v543_v41, 2 }
 0x10d   : > { %v545_v43 = vadd.f32 %v544_v42, %v543_v41 }
 0x10f   : > { %v546_v44 = vrot.slane %v545_v43, 1 }
 0x111   : > { %v547_v45 = vadd.f32 %v546_v44, %v545_v43 }
 0x113   : > { %696 = vpush %v547_v45 }
 0x135   : > { %s693_s30 = spop %692 }
 0x136   : > { %v496_v46 = vstv %s693_s30 }
 0x137   : > { %498 = vst.msk [vmem:[%s265_s29] sm:$0x1] %vm497_vm0, %v496_v46 }
 0x139   : > { %s695_s8 = spop %694 }
 0x13a   : > { %v523_v47 = vstv %s695_s8 }
 0x13b   : > { %524 = vst.msk [vmem:[%s268_s7] sm:$0x1] %vm497_vm0, %v523_v47 }
 0x144   : > { %s697_s12 = spop %696 }
 0x145   : > { %v549_v48 = vstv %s697_s12 }
 0x146   : > { %550 = vst.msk [vmem:[%s271_s11] sm:$0x1] %vm497_vm0, %v549_v48 }
 0x147 PF: > { %s15_s17 = sadd.s32 1, %s762_s17   ;;  %s937_s15 = smov %s758_s16 }
 0x148   : > { %p12_p5 = scmp.ge.s32.totalorder %s15_s17, 4   ;;  %s938_s16 = smov %s940_s18 }
 0x14a   :  { %14 = sbr.rel (!%p12_p5) target bundleno = 2 (0x2), region = 93 }

</bundles_post_ra>
